<compile_context>
chip_gen: v7x
topology: tpu7x:2x2x1
jax: 0.10.0
libtpu: 0.0.40
codegen_flags: <defaults>
</compile_context>

<pallas_src>
import jax
import jax.numpy as jnp
from jax.experimental import pallas as pl
from jax.experimental.pallas import tpu as pltpu


def gin_conv_kernel(eps_ref, adj_ref, xj_ref, xi_ref, w_ref, b_ref, o_ref, acc_ref):
    """One GINConv layer.  Grid = (target row tiles i, source/reduction tiles k)."""
    k = pl.program_id(1)

    @pl.when(k == 0)
    def _():
        acc_ref[...] = jnp.zeros_like(acc_ref)

    # Neighbor aggregation on the MXU: acc[i_tile] += adj[i_tile, k_tile] @ x[k_tile].
    # adj and xj are both bf16 already (pre-cast in the wrapper); f32 accumulation.
    acc_ref[...] += jnp.dot(adj_ref[...], xj_ref[...],
                            preferred_element_type=jnp.float32)

    @pl.when(k == pl.num_programs(1) - 1)
    def _():
        # Self term in f32 (xi may be f32 or bf16), then Linear + ReLU on the MXU.
        z = acc_ref[...] + (1.0 + eps_ref[0]) * xi_ref[...].astype(jnp.float32)
        h = jnp.dot(z.astype(jnp.bfloat16), w_ref[...],
                    preferred_element_type=jnp.float32)
        o_ref[...] = jnp.maximum(h + b_ref[...], 0.0).astype(o_ref.dtype)


def _largest_aligned_divisor(n, cap, align, min_tiles=1):
    """Largest divisor t of n with t <= cap and (t % align == 0 or t == n),
    preferring n // t >= min_tiles when achievable."""
    if min_tiles > 1:
        cap = min(cap, max(align, n // min_tiles))
    cap = min(cap, n)
    for t in range(cap, 0, -1):
        if n % t == 0 and (t % align == 0 or t == n):
            return t
    return n


def gin_conv(x_self, x_src_bf16, adj_bf16, W_bf16, b, eps, *, out_dtype,
             tm=None, tk=None):
    """out = ReLU(((1+eps)*x + adj @ x) @ W + b), row-tiled over target nodes."""
    N, F = x_self.shape
    H = W_bf16.shape[1]

    if tm is None:
        # Row tile: big enough to amortize grid-step overhead & xj re-streaming,
        # but keep >= 2 row tiles so v7x's two TensorCores both get work.
        tm = _largest_aligned_divisor(N, 512, 8, min_tiles=2)
    if tk is None:
        # Reduction tile: it is the lane dim of the adj block -> multiple of 128
        # (or the full N).
        tk = _largest_aligned_divisor(N, 1024, 128)
    assert N % tm == 0 and N % tk == 0, (N, tm, tk)

    # VMEM budget: double-buffered streamed inputs/outputs + resident scratch.
    vmem_bytes = (
        2 * tm * tk * 2                                  # adj tiles (bf16)
        + 2 * tk * F * 2                                 # x[j] tiles (bf16)
        + 2 * tm * F * x_self.dtype.itemsize             # x[i] self tiles
        + 2 * (F * H * 2 + H * 4)                        # W (bf16), b (f32)
        + tm * F * 4                                     # f32 accumulator scratch
        + 2 * tm * H * jnp.dtype(out_dtype).itemsize     # output tiles
    )
    compiler_kwargs = dict(dimension_semantics=("parallel", "arbitrary"))
    # Only raise the scoped VMEM limit when the tiles need it (v5e default 16 MiB);
    # cap well under v7x's 64 MiB physical VMEM.
    if vmem_bytes > 16 * 1024 * 1024:
        compiler_kwargs["vmem_limit_bytes"] = min(int(vmem_bytes * 3) // 2,
                                                  56 * 1024 * 1024)

    grid_spec = pltpu.PrefetchScalarGridSpec(
        num_scalar_prefetch=0,
        grid=(N // tm, N // tk),
        in_specs=[
            pl.BlockSpec(memory_space=pltpu.MemorySpace.SMEM),   # eps (1,)
            pl.BlockSpec((tm, tk), lambda i, k: (i, k)),         # adj tile (bf16)
            pl.BlockSpec((tk, F), lambda i, k: (k, 0)),          # x[j] source tile (bf16)
            pl.BlockSpec((tm, F), lambda i, k: (i, 0)),          # x[i] self tile (k-resident)
            pl.BlockSpec((F, H), lambda i, k: (0, 0)),           # W (grid-resident)
            pl.BlockSpec((1, H), lambda i, k: (0, 0)),           # b (grid-resident)
        ],
        out_specs=pl.BlockSpec((tm, H), lambda i, k: (i, 0)),
        scratch_shapes=[pltpu.VMEM((tm, F), jnp.float32)],       # aggregation accumulator
    )
    return pl.pallas_call(
        gin_conv_kernel,
        out_shape=jax.ShapeDtypeStruct((N, H), out_dtype),
        grid_spec=grid_spec,
        compiler_params=pltpu.CompilerParams(**compiler_kwargs),
    )(eps, adj_bf16, x_src_bf16, x_self, W_bf16, b)


def gin_forward(in_feat, edge_list, W1, b1, eps1, W2, b2, eps2):
    N = in_feat.shape[0]
    # Dense count adjacency: adj[i, j] = multiplicity of edge j -> i (scatter-add,
    # exactly like PyG's sum aggregation with duplicate edges). Small integer
    # counts (<= 256) are exact in bf16, which halves the dominant O(N^2) stream.
    # TODO(synk): on v7x, evaluate fp8(e4m3) adj (exact for counts <= 16) to feed
    #             its fp8-native MXU and halve the adj stream again.
    # TODO(synk): for large sparse graphs, replace the dense adjacency with
    #             CSR + scalar-prefetched offsets/indices (PrefetchScalarGridSpec)
    #             instead of this O(N^2) materialization.
    adj = jnp.zeros((N, N), jnp.float32).at[edge_list[1], edge_list[0]].add(1.0)
    adj = adj.astype(jnp.bfloat16)

    # Layer 1: f32 self term, bf16 source stream, bf16 activations out so that
    # layer 2 consumes bf16 directly (half the inter-layer HBM traffic).
    h1 = gin_conv(in_feat, in_feat.astype(jnp.bfloat16), adj,
                  W1.astype(jnp.bfloat16), b1, eps1, out_dtype=jnp.bfloat16)
    # Layer 2: bf16 in (no extra cast needed), final output in f32.
    h2 = gin_conv(h1, h1, adj, W2.astype(jnp.bfloat16), b2, eps2,
                  out_dtype=jnp.float32)
    return h2


def gin_reference(in_feat, edge_list, W1, b1, eps1, W2, b2, eps2):
    """Pure-JAX f32 reference of the same forward pass (for tolerance check)."""
    N = in_feat.shape[0]
    adj = jnp.zeros((N, N), jnp.float32).at[edge_list[1], edge_list[0]].add(1.0)
    h = jnp.maximum(((1.0 + eps1) * in_feat + adj @ in_feat) @ W1 + b1, 0.0)
    h = jnp.maximum(((1.0 + eps2) * h + adj @ h) @ W2 + b2, 0.0)
    return h


if __name__ == "__main__":
    N, F_IN, HIDDEN, OUT = 256, 64, 128, 128   # lane-dense hidden/out dims

    key = jax.random.PRNGKey(0)
    k_x, k_w1, k_b1, k_w2, k_b2 = jax.random.split(key, 5)

    in_feat = jax.random.normal(k_x, (N, F_IN), jnp.float32)
    W1 = jax.random.normal(k_w1, (F_IN, HIDDEN), jnp.float32) * (1.0 / jnp.sqrt(F_IN))
    b1 = jax.random.normal(k_b1, (1, HIDDEN), jnp.float32) * 0.1
    W2 = jax.random.normal(k_w2, (HIDDEN, OUT), jnp.float32) * (1.0 / jnp.sqrt(HIDDEN))
    b2 = jax.random.normal(k_b2, (1, OUT), jnp.float32) * 0.1
    eps1 = jnp.asarray([0.10], jnp.float32)    # train_eps=True -> learned scalars
    eps2 = jnp.asarray([-0.05], jnp.float32)

    # Deterministic edge list: each node i sends to (i+1), (i+3), (i+7) mod N.
    offsets = jnp.array([1, 3, 7], jnp.int32)
    src = jnp.tile(jnp.arange(N, dtype=jnp.int32), offsets.shape[0])
    dst = (src + jnp.repeat(offsets, N)) % N
    edge_list = jnp.stack([src, dst])          # (2, 768)

    out = gin_forward(in_feat, edge_list, W1, b1, eps1, W2, b2, eps2)
    jax.block_until_ready(out)

    ref = gin_reference(in_feat, edge_list, W1, b1, eps1, W2, b2, eps2)
    assert out.shape == (N, OUT)
    assert bool(jnp.all(jnp.isfinite(out)))
    assert bool(jnp.all(out >= 0.0))           # final ReLU
    # bf16 MXU inputs + bf16 inter-layer activations -> ~1e-2 relative deviation
    # from the f32 reference; generous tolerance documented here.
    assert bool(jnp.allclose(out, ref, rtol=1e-1, atol=1e-1))
    print("KERNEL_OK")
</pallas_src>

<mosaic_0001>
module attributes {stable_mosaic.version = 11 : i64} {
  func.func @gin_conv_kernel(%arg0: i32, %arg1: i32, %arg2: memref<1xf32, #tpu.memory_space<smem>>, %arg3: memref<128x256xbf16, #tpu.memory_space<vmem>>, %arg4: memref<256x64xbf16, #tpu.memory_space<vmem>>, %arg5: memref<128x64xf32, #tpu.memory_space<vmem>>, %arg6: memref<64x128xbf16, #tpu.memory_space<vmem>>, %arg7: memref<1x128xf32, #tpu.memory_space<vmem>>, %arg8: memref<128x128xbf16, #tpu.memory_space<vmem>>, %arg9: memref<128x64xf32, #tpu.memory_space<vmem>>) attributes {dimension_semantics = [#tpu.dimension_semantics<parallel>, #tpu.dimension_semantics<arbitrary>], iteration_bounds = array<i64: 2, 1>, scalar_prefetch = 0 : i64, scratch_operands = 1 : i64, tpu.core_type = #tpu.core_type<tc>, window_params = [{transform_indices = @transform_0, window_bounds = array<i64: 1>}, {transform_indices = @transform_1, window_bounds = array<i64: 128, 256>}, {transform_indices = @transform_2, window_bounds = array<i64: 256, 64>}, {transform_indices = @transform_3, window_bounds = array<i64: 128, 64>}, {pipeline_mode = #tpu.pipeline_mode<synchronous>, transform_indices = @transform_4, window_bounds = array<i64: 64, 128>}, {pipeline_mode = #tpu.pipeline_mode<synchronous>, transform_indices = @transform_5, window_bounds = array<i64: 1, 128>}, {transform_indices = @transform_6, window_bounds = array<i64: 128, 128>}]} {
    %c0_i32 = arith.constant 0 : i32
    %0 = arith.cmpi eq, %arg1, %c0_i32 : i32
    %1 = arith.extui %0 : i1 to i32
    %c0_i32_0 = arith.constant 0 : i32
    %2 = arith.cmpi ne, %1, %c0_i32_0 : i32
    scf.if %2 {
      %cst_10 = arith.constant 0.000000e+00 : f32
      %12 = vector.broadcast %cst_10 : f32 to vector<128x64xf32>
      %c0_11 = arith.constant 0 : index
      %c0_12 = arith.constant 0 : index
      %13 = vector.load %arg9[%c0_11, %c0_12] : memref<128x64xf32, #tpu.memory_space<vmem>>, vector<128x64xf32>
      tpu.vector_store %arg9[%c0_11, %c0_12], %12 {strides = array<i32>} : memref<128x64xf32, #tpu.memory_space<vmem>>, vector<128x64xf32>,
    } else {
    }
    %c0 = arith.constant 0 : index
    %c0_1 = arith.constant 0 : index
    %3 = vector.load %arg9[%c0, %c0_1] : memref<128x64xf32, #tpu.memory_space<vmem>>, vector<128x64xf32>
    %c0_2 = arith.constant 0 : index
    %c0_3 = arith.constant 0 : index
    %4 = vector.load %arg3[%c0_2, %c0_3] : memref<128x256xbf16, #tpu.memory_space<vmem>>, vector<128x256xbf16>
    %c0_4 = arith.constant 0 : index
    %c0_5 = arith.constant 0 : index
    %5 = vector.load %arg4[%c0_4, %c0_5] : memref<256x64xbf16, #tpu.memory_space<vmem>>, vector<256x64xbf16>
    %cst = arith.constant dense<0.000000e+00> : vector<128x64xf32>
    %6 = tpu.matmul %4, %5, %cst {dimension_numbers = #tpu.dot_dimension_numbers<[1], [0], [0], [1], [0, 0, 1, 1], [], []>} : vector<128x256xbf16>, vector<256x64xbf16>, vector<128x64xf32> -> vector<128x64xf32>
    %7 = arith.addf %3, %6 : vector<128x64xf32>
    %c0_6 = arith.constant 0 : index
    %c0_7 = arith.constant 0 : index
    %8 = vector.load %arg9[%c0_6, %c0_7] : memref<128x64xf32, #tpu.memory_space<vmem>>, vector<128x64xf32>
    tpu.vector_store %arg9[%c0_6, %c0_7], %7 {strides = array<i32>} : memref<128x64xf32, #tpu.memory_space<vmem>>, vector<128x64xf32>,
    %c0_i32_8 = arith.constant 0 : i32
    %9 = arith.cmpi eq, %arg1, %c0_i32_8 : i32
    %10 = arith.extui %9 : i1 to i32
    %c0_i32_9 = arith.constant 0 : i32
    %11 = arith.cmpi ne, %10, %c0_i32_9 : i32
    scf.if %11 {
      %c0_10 = arith.constant 0 : index
      %c0_11 = arith.constant 0 : index
      %12 = vector.load %arg9[%c0_10, %c0_11] : memref<128x64xf32, #tpu.memory_space<vmem>>, vector<128x64xf32>
      %c0_12 = arith.constant 0 : index
      %13 = memref.load %arg2[%c0_12] : memref<1xf32, #tpu.memory_space<smem>>
      %cst_13 = arith.constant 1.000000e+00 : f32
      %14 = arith.addf %cst_13, %13 : f32
      %c0_14 = arith.constant 0 : index
      %c0_15 = arith.constant 0 : index
      %15 = vector.load %arg5[%c0_14, %c0_15] : memref<128x64xf32, #tpu.memory_space<vmem>>, vector<128x64xf32>
      %16 = vector.broadcast %14 : f32 to vector<128x64xf32>
      %17 = arith.mulf %16, %15 : vector<128x64xf32>
      %18 = arith.addf %12, %17 : vector<128x64xf32>
      %19 = arith.truncf %18 : vector<128x64xf32> to vector<128x64xbf16>
      %c0_16 = arith.constant 0 : index
      %c0_17 = arith.constant 0 : index
      %20 = vector.load %arg6[%c0_16, %c0_17] : memref<64x128xbf16, #tpu.memory_space<vmem>>, vector<64x128xbf16>
      %cst_18 = arith.constant dense<0.000000e+00> : vector<128x128xf32>
      %21 = tpu.matmul %19, %20, %cst_18 {dimension_numbers = #tpu.dot_dimension_numbers<[1], [0], [0], [1], [0, 0, 1, 1], [], []>} : vector<128x64xbf16>, vector<64x128xbf16>, vector<128x128xf32> -> vector<128x128xf32>
      %c0_19 = arith.constant 0 : index
      %c0_20 = arith.constant 0 : index
      %22 = vector.load %arg7[%c0_19, %c0_20] : memref<1x128xf32, #tpu.memory_space<vmem>>, vector<1x128xf32>
      %23 = vector.broadcast %22 : vector<1x128xf32> to vector<128x128xf32>
      %24 = arith.addf %21, %23 : vector<128x128xf32>
      %cst_21 = arith.constant 0.000000e+00 : f32
      %25 = vector.broadcast %cst_21 : f32 to vector<128x128xf32>
      %26 = arith.maximumf %24, %25 : vector<128x128xf32>
      %27 = arith.truncf %26 : vector<128x128xf32> to vector<128x128xbf16>
      %c0_22 = arith.constant 0 : index
      %c0_23 = arith.constant 0 : index
      %28 = vector.load %arg8[%c0_22, %c0_23] : memref<128x128xbf16, #tpu.memory_space<vmem>>, vector<128x128xbf16>
      tpu.vector_store %arg8[%c0_22, %c0_23], %27 {strides = array<i32>} : memref<128x128xbf16, #tpu.memory_space<vmem>>, vector<128x128xbf16>,
    } else {
    }
    return
  }
  func.func @transform_0(%arg0: i32, %arg1: i32) -> i32 {
    %c0_i32 = arith.constant 0 : i32
    %c0_i32_0 = arith.constant 0 : i32
    return %c0_i32 : i32
  }
  func.func @transform_1(%arg0: i32, %arg1: i32) -> (i32, i32) {
    %c0_i32 = arith.constant 0 : i32
    return %arg0, %arg1 : i32, i32
  }
  func.func @transform_2(%arg0: i32, %arg1: i32) -> (i32, i32) {
    %c0_i32 = arith.constant 0 : i32
    %c0_i32_0 = arith.constant 0 : i32
    return %arg1, %c0_i32 : i32, i32
  }
  func.func @transform_3(%arg0: i32, %arg1: i32) -> (i32, i32) {
    %c0_i32 = arith.constant 0 : i32
    %c0_i32_0 = arith.constant 0 : i32
    return %arg0, %c0_i32 : i32, i32
  }
  func.func @transform_4(%arg0: i32, %arg1: i32) -> (i32, i32) {
    %c0_i32 = arith.constant 0 : i32
    %c0_i32_0 = arith.constant 0 : i32
    %c0_i32_1 = arith.constant 0 : i32
    return %c0_i32, %c0_i32_0 : i32, i32
  }
  func.func @transform_5(%arg0: i32, %arg1: i32) -> (i32, i32) {
    %c0_i32 = arith.constant 0 : i32
    %c0_i32_0 = arith.constant 0 : i32
    %c0_i32_1 = arith.constant 0 : i32
    return %c0_i32, %c0_i32_0 : i32, i32
  }
  func.func @transform_6(%arg0: i32, %arg1: i32) -> (i32, i32) {
    %c0_i32 = arith.constant 0 : i32
    %c0_i32_0 = arith.constant 0 : i32
    return %arg0, %c0_i32 : i32, i32
  }
}

</mosaic_0001>

<bundles_post_ra>
// kernel: tpu_custom_call.1
= control target key start
LH: loop header
LB: loop body
LE: loop exit
PB: predicated region body
PF: predicated region fallthrough
CT: control target
= control target key end

     0   :  { %s1954_s0 = inlined_call_operand.<no memory space> [shape: f32[1], index: 0, kind: input, shape index: {}]   ;;  %s1955_s1 = inlined_call_operand.vmem [shape: bf16[256,256], index: 1, kind: input, shape index: {}]   ;;  %s1956_s2 = inlined_call_operand.vmem [shape: bf16[256,64], index: 2, kind: input, shape index: {}]   ;;  %s1957_s3 = inlined_call_operand.vmem [shape: f32[256,64], index: 3, kind: input, shape index: {}]   ;;  %s1958_s4 = inlined_call_operand.vmem [shape: bf16[64,128], index: 4, kind: input, shape index: {}]   ;;  %s1959_s5 = inlined_call_operand.vmem [shape: f32[1,128], index: 5, kind: input, shape index: {}]   ;;  %s1960_s6 = inlined_call_operand.hbm [shape: bf16[256,128], index: 6, kind: output, shape index: {}]  }
   0x1   :  { %11 = sst [smem:[#allocation3]] %s1954_s0 }
   0x2   :  { %12 = vsyncpa [#allocation5], 0 }
   0x3   :  { %14 = vsyncpa [#allocation5 + $0x1], 0  ;;  %s1655_s23 = smov 0   ;;  %s1657_s24 = smov 0  }
   0x4   :  { %s1659_s25 = smov 0   ;;  %s1661_s26 = smov 0  }
   0x5   :  { %s1663_s27 = smov 0   ;;  %s1665_s28 = smov 0  }
   0x6 LB: > { %s1172_s0 = sadd.s32 4294967295, %s1611_s28   ;;  %s1173_s29 = sadd.s32 4294967294, %s1611_s28   ;;  %s1611_s28 = sphi %s1665_s28, %s20_s28   ;;  %s1607_s27 = sphi %s1663_s27, %s1967_s27   ;;  %s1603_s26 = sphi %s1661_s26, %s1966_s26   ;;  %s1599_s25 = sphi %s1659_s25, %s1965_s25   ;;  %s1595_s24 = sphi %s1657_s24, %s1964_s24   ;;  %s1591_s23 = sphi %s1655_s23, %s1963_s23  }
   0x7   : > { %s32_s30 = sadd.s32 1, %s1607_s27  ;;  %s182_s7 = sadd.s32 1, %s1599_s25 }
   0x8   : > { %p34_p0 = scmp.ge.s32.totalorder %s32_s30, 2  ;;  %p192_p1 = scmp.ne.s32.totalorder %s1599_s25, %s1595_s24 }
   0x9   : > { %p193_p2 = scmp.eq.s32.totalorder %s1172_s0, 1  ;;  %p198_p3 = scmp.ne.s32.totalorder %s1595_s24, %s1591_s23 }
   0xa   : > { %s1969_s30 = smov (%p34_p0, %s32_s30), 0  ;;  %p199_p5 = scmp.eq.s32.totalorder %s1173_s29, 1 }
   0xb   : > { %p1695_p4 = por %p193_p2, %p192_p1  ;;  %s179_s9 = ssub.s32 %s1607_s27, %s1969_s30 }
   0xc   : > { %p1177_p6 = scmp.ge.s32.totalorder %s1611_s28, 1  ;;  %p180_p7 = scmp.eq.s32.totalorder %s179_s9, 0 }
   0xd   : > { %p1702_p8 = por %p199_p5, %p198_p3  ;;  %p259_p9 = scmp.lt.s32.totalorder %s1611_s28, 3 }
   0xe   : > { %s1708_s11 = scalar_select %p180_p7, %s1599_s25, %s182_s7  }
   0xf   : > { %p260_p10 = pnand %p1177_p6, %p259_p9 }
  0x10   : > { %v1489_v0 = vld [vmem:[%s1956_s2 + $0x40] sm:$0xff] (!%p260_p10)   ;;  %s1179_s14 = sshll.u32 (!%p260_p10), %s1603_s26, 4  ;;  %v1491_v2 = vld [vmem:[%s1956_s2 + $0x48] sm:$0xff] (!%p260_p10)   ;;  %v1493_v4 = vld [vmem:[%s1956_s2 + $0x50] sm:$0xff] (!%p260_p10)   ;;  %vm334_vm0 = vcmask (!%p260_p10), 523264   ;;  %v1613_v32 = vmov (!%p260_p10), 0.0  }
  0x11   : > { %263 = sbr.rel (%p260_p10) target bundleno = 564 (0x234), region = 44  ;;  %v1490_v1 = vld [vmem:[%s1956_s2] sm:$0xff] (!%p260_p10)   ;;  %1315 = vmatprep.subr.bf16.mxu0 (!%p260_p10), %v1489_v0  ;;  %1415 = vmatprep.subr.bf16.mxu1 (!%p260_p10), %v1489_v0  ;;  %v1492_v3 = vld [vmem:[%s1956_s2 + $0x8] sm:$0xff] (!%p260_p10)   ;;  %p306_p11 = scmp.lt.s32.totalorder (!%p260_p10), %s1179_s14, 31  ;;  %v1494_v5 = vld [vmem:[%s1956_s2 + $0x10] sm:$0xff] (!%p260_p10)   ;;  %335 = vst.msk [vmem:[#allocation2] sm:$0xff] (!%p260_p10), %vm334_vm0, %v1613_v32 }
  0x12   : > { %1316 = vmatpush3.bf16.msra.mxu0 (!%p260_p10), %v1490_v1  ;;  %1423 = vmatpush3.bf16.msra.mxu1 (!%p260_p10), %v1490_v1  ;;  %v1495_v6 = vld [vmem:[%s1956_s2 + $0x58] sm:$0xff] (!%p260_p10)   ;;  %v1497_v8 = vld [vmem:[%s1956_s2 + $0x60] sm:$0xff] (!%p260_p10)   ;;  %v1499_v10 = vld [vmem:[%s1956_s2 + $0x68] sm:$0xff] (!%p260_p10)   ;;  %336 = vst.msk [vmem:[#allocation2 + $0x8] sm:$0xff] (!%p260_p10), %vm334_vm0, %v1613_v32  ;;  %s1813_s17 = sld [smem:[#allocation3]] (!%p260_p10)  ;;  %s1267_s7 = sshll.u32 (!%p260_p10), %s1603_s26, 10 }
  0x13   : > { %1317 = vmatprep.subr.bf16.mxu0 (!%p260_p10), %v1491_v2  ;;  %1416 = vmatprep.subr.bf16.mxu1 (!%p260_p10), %v1491_v2  ;;  %v1496_v7 = vld [vmem:[%s1956_s2 + $0x18] sm:$0xff] (!%p260_p10)   ;;  %v1498_v9 = vld [vmem:[%s1956_s2 + $0x20] sm:$0xff] (!%p260_p10)   ;;  %v1500_v12 = vld [vmem:[%s1956_s2 + $0x28] sm:$0xff] (!%p260_p10)   ;;  %337 = vst.msk [vmem:[#allocation2 + $0x10] sm:$0xff] (!%p260_p10), %vm334_vm0, %v1613_v32  ;;  %s1900_s16 = scalar_lea.hbm (!%p260_p10), %s1960_s6, %s1267_s7 }
  0x14   : > { %v1501_v13 = vld [vmem:[%s1956_s2 + $0x70] sm:$0xff] (!%p260_p10)   ;;  %v1503_v16 = vld [vmem:[%s1956_s2 + $0x78] sm:$0xff] (!%p260_p10)   ;;  %338 = vst.msk [vmem:[#allocation2 + $0x18] sm:$0xff] (!%p260_p10), %vm334_vm0, %v1613_v32  ;;  %339 = vst.msk [vmem:[#allocation2 + $0x20] sm:$0xff] (!%p260_p10), %vm334_vm0, %v1613_v32 }
  0x15   : > { %v1502_v14 = vld [vmem:[%s1956_s2 + $0x30] sm:$0xff] (!%p260_p10)   ;;  %v1504_v17 = vld [vmem:[%s1956_s2 + $0x38] sm:$0xff] (!%p260_p10)   ;;  %340 = vst.msk [vmem:[#allocation2 + $0x28] sm:$0xff] (!%p260_p10), %vm334_vm0, %v1613_v32  ;;  %341 = vst.msk [vmem:[#allocation2 + $0x30] sm:$0xff] (!%p260_p10), %vm334_vm0, %v1613_v32 }
  0x16   : > { %1318 = vmatpush3.bf16.msra.mxu0 (!%p260_p10), %v1492_v3  ;;  %1424 = vmatpush3.bf16.msra.mxu1 (!%p260_p10), %v1492_v3  ;;  %342 = vst.msk [vmem:[#allocation2 + $0x38] sm:$0xff] (!%p260_p10), %vm334_vm0, %v1613_v32  ;;  %343 = vst.msk [vmem:[#allocation2 + $0x40] sm:$0xff] (!%p260_p10), %vm334_vm0, %v1613_v32  ;;  %v1529_v33 = vld [vmem:[%s1958_s4] sm:$0xff] (!%p260_p10)   ;;  %v1530_v34 = vld [vmem:[%s1958_s4 + $0x8] sm:$0xff] (!%p260_p10)  }
  0x17   : > { %1319 = vmatprep.subr.bf16.mxu0 (!%p260_p10), %v1493_v4  ;;  %1417 = vmatprep.subr.bf16.mxu1 (!%p260_p10), %v1493_v4  ;;  %344 = vst.msk [vmem:[#allocation2 + $0x48] sm:$0xff] (!%p260_p10), %vm334_vm0, %v1613_v32  ;;  %345 = vst.msk [vmem:[#allocation2 + $0x50] sm:$0xff] (!%p260_p10), %vm334_vm0, %v1613_v32  ;;  %v1531_v35 = vld [vmem:[%s1958_s4 + $0x10] sm:$0xff] (!%p260_p10)   ;;  %v1532_v36 = vld [vmem:[%s1958_s4 + $0x18] sm:$0xff] (!%p260_p10)  }
  0x18   : > { %s1971_s14 = smov (!%p306_p11, %s1179_s14), 31  ;;  %346 = vst.msk [vmem:[#allocation2 + $0x58] sm:$0xff] %vm334_vm0, %v1613_v32  ;;  %347 = vst.msk [vmem:[#allocation2 + $0x60] sm:$0xff] %vm334_vm0, %v1613_v32  ;;  %v351_v38 = vld [vmem:[#allocation2] sm:$0xff]  ;;  %s741_s18 = sadd.f32 1.0, %s1813_s17 }
  0x19   : > { %s1250_s15 = sshll.u32 %s1971_s14, 3  ;;  %348 = vst.msk [vmem:[#allocation2 + $0x68] sm:$0xff] %vm334_vm0, %v1613_v32  ;;  %349 = vst.msk [vmem:[#allocation2 + $0x70] sm:$0xff] %vm334_vm0, %v1613_v32  ;;  %v352_v45 = vld [vmem:[#allocation2 + $0x8] sm:$0xff] }
  0x1a   : > { %1320 = vmatpush3.bf16.msra.mxu0 %v1494_v5  ;;  %1425 = vmatpush3.bf16.msra.mxu1 %v1494_v5  ;;  %s1746_s20 = scalar_lea.vmem %s1955_s1, %s1250_s15  ;;  %350 = vst.msk [vmem:[#allocation2 + $0x78] sm:$0xff] %vm334_vm0, %v1613_v32  ;;  %s1821_s22 = scalar_lea.vmem %s1957_s3, %s1250_s15  ;;  %v353_v58 = vld [vmem:[#allocation2 + $0x10] sm:$0xff]  ;;  %v1828_v62 = vstv %s741_s18 }
  0x1b   : > { %1321 = vmatprep.subr.bf16.mxu0 %v1495_v6  ;;  %1418 = vmatprep.subr.bf16.mxu1 %v1495_v6  ;;  %v1507_v11 = vld [vmem:[%s1746_s20 + $0x4] ss:$8 sps:$4 sm:$0xff]   ;;  %v1505_v18 = vld [vmem:[%s1746_s20] ss:$8 sps:$4 sm:$0xff]   ;;  %v1508_v19 = vld [vmem:[%s1746_s20 + $0x14] ss:$8 sps:$4 sm:$0xff]  }
  0x1c   : > { %623 = vmatprep.mubr.bf16.mxu0 %v1507_v11  ;;  %v1522_v15 = vld [vmem:[%s1746_s20 + $0x64] ss:$8 sps:$4 sm:$0xff]   ;;  %v1520_v20 = vld [vmem:[%s1746_s20 + $0x60] ss:$8 sps:$4 sm:$0xff]   ;;  %v1526_v21 = vld [vmem:[%s1746_s20 + $0x74] ss:$8 sps:$4 sm:$0xff]  }
  0x1d   : > { %671 = vmatprep.mubr.bf16.mxu1 %v1522_v15  ;;  %v1510_v22 = vld [vmem:[%s1746_s20 + $0x10] ss:$8 sps:$4 sm:$0xff]   ;;  %v1511_v23 = vld [vmem:[%s1746_s20 + $0x24] ss:$8 sps:$4 sm:$0xff]   ;;  %v1513_v25 = vld [vmem:[%s1746_s20 + $0x20] ss:$8 sps:$4 sm:$0xff]  }
  0x1e   : > { %1322 = vmatpush3.bf16.msra.mxu0 %v1496_v7  ;;  %1426 = vmatpush3.bf16.msra.mxu1 %v1496_v7  ;;  %v1528_v24 = vld [vmem:[%s1746_s20 + $0x70] ss:$8 sps:$4 sm:$0xff]   ;;  %v1514_v26 = vld [vmem:[%s1746_s20 + $0x34] ss:$8 sps:$4 sm:$0xff]   ;;  %v1517_v28 = vld [vmem:[%s1746_s20 + $0x44] ss:$8 sps:$4 sm:$0xff]  }
  0x1f   : > { %1323 = vmatprep.subr.bf16.mxu0 %v1497_v8  ;;  %1419 = vmatprep.subr.bf16.mxu1 %v1497_v8  ;;  %v1516_v27 = vld [vmem:[%s1746_s20 + $0x30] ss:$8 sps:$4 sm:$0xff]   ;;  %v1519_v29 = vld [vmem:[%s1746_s20 + $0x40] ss:$8 sps:$4 sm:$0xff]   ;;  %v1523_v30 = vld [vmem:[%s1746_s20 + $0x54] ss:$8 sps:$4 sm:$0xff]  }
  0x20   : > { %v1525_v31 = vld [vmem:[%s1746_s20 + $0x50] ss:$8 sps:$4 sm:$0xff]   ;;  %v363_v43 = vld [vmem:[#allocation2 + $0x60] sm:$0xff]  ;;  %v364_v51 = vld [vmem:[#allocation2 + $0x68] sm:$0xff]  ;;  %s301_s20 = sand.u32 1, %s1595_s24   ;;  %s1614_s18 = smov [#allocation4]  }
  0x21   : > { %v742_v60 = vld [vmem:[%s1821_s22] sm:$0xff]  ;;  %v743_v61 = vld [vmem:[%s1821_s22 + $0x8] sm:$0xff]  ;;  %v365_v2 = vld [vmem:[#allocation2 + $0x70] sm:$0xff]  ;;  %s1178_s0 = sshll.u32 %s301_s20, 6  ;;  %s1908_s26 = scalar_lea.sflag [#allocation5], %s301_s20 }
  0x22   : > { %1324 = vmatpush3.bf16.msra.mxu0 %v1498_v9  ;;  %1427 = vmatpush3.bf16.msra.mxu1 %v1498_v9  ;;  %v354_v4 = vld [vmem:[#allocation2 + $0x18] sm:$0xff]  ;;  %v760_v11 = vmul.f32 %v1828_v62, %v743_v61  ;;  %v359_v61 = vld [vmem:[#allocation2 + $0x40] sm:$0xff]  ;;  %s1887_s29 = scalar_lea.vmem [#allocation4], %s1178_s0  ;;  %s1537_s19 = sshll.u32 %s1614_s18, 4  ;;  %s1538_s19 = int_to_ptr.vmem [resolvable:$false] %s1537_s19 }
  0x23   : > { %1325 = vmatprep.subr.bf16.mxu0 %v1499_v10  ;;  %1420 = vmatprep.subr.bf16.mxu1 %v1499_v10  ;;  %v759_v10 = vmul.f32 %v1828_v62, %v742_v60  ;;  %s1069_s9 = sshll.u32 %s1887_s29, 4  ;;  %s1539_s21 = scalar_lea.vmem %s1538_s19, 2048  ;;  %s1902_s9 = int_to_ptr.vmem [resolvable:$true] %s1069_s9 }
  0x24   : > { %s1533_s17 = scalar_lea.vmem %s1902_s9, 1024  ;;  %p1540_p1 = scmp.lt.s32.totalorder %s1902_s9, %s1538_s19 }
  0x25   : > { %p1534_p12 = scmp.ne.s32.totalorder %s1902_s9, %s1533_s17  ;;  %p1541_p2 = scmp.lt.s32.totalorder %s1539_s21, %s1533_s17 }
  0x26   : > { %1326 = vmatpush3.bf16.msra.mxu0 %v1500_v12  ;;  %1428 = vmatpush3.bf16.msra.mxu1 %v1500_v12  ;;  %v366_v12 = vld [vmem:[#allocation2 + $0x78] sm:$0xff] }
  0x27   : > { %1327 = vmatprep.subr.bf16.mxu0 %v1501_v13  ;;  %1421 = vmatprep.subr.bf16.mxu1 %v1501_v13  ;;  %p1535_p13 = pnand %p1534_p12, %p1695_p4  ;;  %p1542_p3 = por %p1541_p2, %p1540_p1 }
  0x29   : > { %p1536_p0 = pneg %p1535_p13 }
  0x2a   : > { %1328 = vmatpush3.bf16.msra.mxu0 %v1502_v14  ;;  %1429 = vmatpush3.bf16.msra.mxu1 %v1502_v14 }
  0x2b   : > { %1329 = vmatprep.subr.bf16.mxu0 %v1503_v16  ;;  %1422 = vmatprep.subr.bf16.mxu1 %v1503_v16  ;;  %p1543_p5 = pnand %p1542_p3, %p1536_p0 }
  0x2e   : > { %1330 = vmatpush3.bf16.msra.mxu0 %v1504_v17  ;;  %1430 = vmatpush3.bf16.msra.mxu1 %v1504_v17 }
  0x2f   : > { %1391 = vmatprep.subr.bf16.mxu1 %v1529_v33 }
  0x31   : > { %624 = vmatmul.mubr.bf16.vlgmr.msra.gmra.mrb[0].mxu0 %v1505_v18  ;;  %672 = vmatmul.mubr.bf16.vlgmr.msra.gmra.mrb[0].mxu1 %v1520_v20 }
  0x32   : > { %631 = vmatprep.mubr.bf16.mxu0 %v1508_v19  ;;  %679 = vmatprep.mubr.bf16.mxu1 %v1526_v21 }
  0x33   : > { %1392 = vmatpush3.bf16.msra.mxu1 %v1529_v33 }
  0x34   : > { %1393 = vmatprep.subr.bf16.mxu1 %v1530_v34 }
  0x37   : > { %1394 = vmatpush3.bf16.msra.mxu1 %v1530_v34 }
  0x38   : > { %1395 = vmatprep.subr.bf16.mxu1 %v1531_v35 }
  0x39   : > { %632 = vmatmul.mubr.bf16.gmra.mrb[4].mxu0 %v1510_v22  ;;  %680 = vmatmul.mubr.bf16.gmra.mrb[4].mxu1 %v1528_v24 }
  0x3a   : > { %639 = vmatprep.mubr.bf16.mxu0 %v1511_v23  ;;  %v355_v23 = vld [vmem:[#allocation2 + $0x20] sm:$0xff] }
  0x3b   : > { %1396 = vmatpush3.bf16.msra.mxu1 %v1531_v35 }
  0x3c   : > { %1397 = vmatprep.subr.bf16.mxu1 %v1532_v36 }
  0x3f   : > { %1398 = vmatpush3.bf16.msra.mxu1 %v1532_v36 }
  0x41   : > { %640 = vmatmul.mubr.bf16.gmra.mrb[8].mxu0 %v1513_v25  ;;  %v744_v25 = vld [vmem:[%s1821_s22 + $0x10] sm:$0xff] }
  0x42   : > { %647 = vmatprep.mubr.bf16.mxu0 %v1514_v26  ;;  %v745_v26 = vld [vmem:[%s1821_s22 + $0x18] sm:$0xff]  ;;  %v761_v34 = vmul.f32 %v1828_v62, %v744_v25 }
  0x43   : > { %v762_v35 = vmul.f32 %v1828_v62, %v745_v26 }
  0x49   : > { %648 = vmatmul.mubr.bf16.gmra.mrb[12].mxu0 %v1516_v27 }
  0x4a   : > { %655 = vmatprep.mubr.bf16.mxu0 %v1517_v28 }
  0x51   : > { %656 = vmatmul.mubr.bf16.gmra.mrb[16].mxu0 %v1519_v29 }
  0x52   : > { %663 = vmatprep.mubr.bf16.mxu0 %v1523_v30  ;;  %v356_v30 = vld [vmem:[#allocation2 + $0x28] sm:$0xff] }
  0x59   : > { %664 = vmatmul.mubr.bf16.gmra.mrb[20].mxu0 %v1525_v31 }
 0x104   : > { %v1331_v37 = vpop.f32.mrb[0].mxu0  ;;  %v1367_v40 = vpop.f32.mrb[0].mxu1 }
 0x105   : > { %v1332_v39 = vpop.f32.mrb[1].mxu0  ;;  %v1368_v44 = vpop.f32.mrb[1].mxu1 }
 0x106   : > { %v1333_v41 = vadd.f32 %v1332_v39, %v1331_v37  ;;  %v1334_v42 = vpop.f32.mrb[2].mxu0  ;;  %v1369_v47 = vadd.f32 %v1368_v44, %v1367_v40  ;;  %v1370_v48 = vpop.f32.mrb[2].mxu1  ;;  %v746_v44 = vld [vmem:[%s1821_s22 + $0x20] sm:$0xff] }
 0x107   : > { %v1335_v46 = vpop.f32.mrb[3].mxu0  ;;  %v1371_v52 = vpop.f32.mrb[3].mxu1 }
 0x108   : > { %v688_v49 = vadd.f32 %v1333_v41, %v351_v38  ;;  %v1336_v50 = vadd.f32 %v1335_v46, %v1334_v42  ;;  %v700_v53 = vadd.f32 %v1369_v47, %v363_v43  ;;  %v1372_v54 = vadd.f32 %v1371_v52, %v1370_v48  ;;  %v357_v42 = vld [vmem:[#allocation2 + $0x30] sm:$0xff] }
 0x10a   : > { %705 = vst.msk [vmem:[#allocation2] sm:$0xff] %vm334_vm0, %v688_v49  ;;  %v689_v55 = vadd.f32 %v1336_v50, %v352_v45  ;;  %717 = vst.msk [vmem:[#allocation2 + $0x60] sm:$0xff] %vm334_vm0, %v700_v53  ;;  %v701_v56 = vadd.f32 %v1372_v54, %v364_v51  ;;  %v747_v45 = vld [vmem:[%s1821_s22 + $0x28] sm:$0xff]  ;;  %v358_v49 = vld [vmem:[#allocation2 + $0x38] sm:$0xff]  ;;  %v763_v53 = vmul.f32 %v1828_v62, %v746_v44 }
 0x10b   : > { %v764_v54 = vmul.f32 %v1828_v62, %v747_v45 }
 0x10c   : > { %706 = vst.msk [vmem:[#allocation2 + $0x8] sm:$0xff] %vm334_vm0, %v689_v55  ;;  %v1337_v57 = vpop.f32.mrb[4].mxu0  ;;  %718 = vst.msk [vmem:[#allocation2 + $0x68] sm:$0xff] %vm334_vm0, %v701_v56  ;;  %v1373_v63 = vpop.f32.mrb[4].mxu1 }
 0x10d   : > { %v1338_v59 = vpop.f32.mrb[5].mxu0  ;;  %v1374_v3 = vpop.f32.mrb[5].mxu1 }
 0x10e   : > { %v1339_v0 = vadd.f32 %v1338_v59, %v1337_v57  ;;  %v1340_v1 = vpop.f32.mrb[6].mxu0  ;;  %v1375_v6 = vadd.f32 %v1374_v3, %v1373_v63  ;;  %v1376_v7 = vpop.f32.mrb[6].mxu1 }
 0x10f   : > { %v1341_v5 = vpop.f32.mrb[7].mxu0  ;;  %v1377_v13 = vpop.f32.mrb[7].mxu1 }
 0x110   : > { %v690_v8 = vadd.f32 %v1339_v0, %v353_v58  ;;  %v1342_v9 = vadd.f32 %v1341_v5, %v1340_v1  ;;  %v702_v15 = vadd.f32 %v1375_v6, %v365_v2  ;;  %v1378_v16 = vadd.f32 %v1377_v13, %v1376_v7  ;;  %v748_v0 = vld [vmem:[%s1821_s22 + $0x30] sm:$0xff]  ;;  %v749_v1 = vld [vmem:[%s1821_s22 + $0x38] sm:$0xff]  ;;  %v360_v5 = vld [vmem:[#allocation2 + $0x48] sm:$0xff] }
 0x111   : > { %v724_v14 = vld [vmem:[#allocation2] sm:$0xff] }
 0x112   : > { %707 = vst.msk [vmem:[#allocation2 + $0x10] sm:$0xff] %vm334_vm0, %v690_v8  ;;  %v691_v17 = vadd.f32 %v1342_v9, %v354_v4  ;;  %719 = vst.msk [vmem:[#allocation2 + $0x70] sm:$0xff] %vm334_vm0, %v702_v15  ;;  %v703_v19 = vadd.f32 %v1378_v16, %v366_v12  ;;  %v775_v21 = vadd.f32 %v759_v10, %v724_v14  ;;  %v736_v44 = vld [vmem:[#allocation2 + $0x60] sm:$0xff] }
 0x113   : > { %v725_v18 = vld [vmem:[#allocation2 + $0x8] sm:$0xff]  ;;  %v765_v9 = vmul.f32 %v1828_v62, %v748_v0  ;;  %v766_v10 = vmul.f32 %v1828_v62, %v749_v1  ;;  %v1216_v0 = vld [vmem:[%s1959_s5] ss:$0 sm:$0xff] }
 0x114   : > { %708 = vst.msk [vmem:[#allocation2 + $0x18] sm:$0xff] %vm334_vm0, %v691_v17  ;;  %v1343_v20 = vpop.f32.mrb[8].mxu0  ;;  %v776_v22 = vadd.f32 %v760_v11, %v725_v18  ;;  %720 = vst.msk [vmem:[#allocation2 + $0x78] sm:$0xff] %vm334_vm0, %v703_v19  ;;  %v361_v17 = vld [vmem:[#allocation2 + $0x50] sm:$0xff]  ;;  %v750_v19 = vld [vmem:[%s1821_s22 + $0x40] sm:$0xff] }
 0x115   : > { %v1344_v24 = vpop.f32.mrb[9].mxu0  ;;  %v737_v45 = vld [vmem:[#allocation2 + $0x68] sm:$0xff] }
 0x116   : > { %v1345_v27 = vadd.f32 %v1344_v24, %v1343_v20  ;;  %v1346_v28 = vpop.f32.mrb[10].mxu0  ;;  %v791_v29 = vpack.c.bf16 %v776_v22, %v775_v21  ;;  %v751_v20 = vld [vmem:[%s1821_s22 + $0x48] sm:$0xff]  ;;  %v362_v24 = vld [vmem:[#allocation2 + $0x58] sm:$0xff] }
 0x117   : > { %v1347_v31 = vpop.f32.mrb[11].mxu0 }
 0x118   : > { %v692_v32 = vadd.f32 %v1345_v27, %v355_v23  ;;  %v1348_v33 = vadd.f32 %v1347_v31, %v1346_v28  ;;  %1399 = vmatprep.mubr.msk.bf16.mxu1 %vm334_vm0, %v791_v29  ;;  %v767_v28 = vmul.f32 %v1828_v62, %v750_v19  ;;  %v768_v29 = vmul.f32 %v1828_v62, %v751_v20 }
 0x119   : > { %v726_v36 = vld [vmem:[#allocation2 + $0x10] sm:$0xff] }
 0x11a   : > { %709 = vst.msk [vmem:[#allocation2 + $0x20] sm:$0xff] %vm334_vm0, %v692_v32  ;;  %v693_v37 = vadd.f32 %v1348_v33, %v356_v30  ;;  %v777_v40 = vadd.f32 %v761_v34, %v726_v36  ;;  %v755_v36 = vld [vmem:[%s1821_s22 + $0x68] sm:$0xff] }
 0x11b   : > { %v727_v38 = vld [vmem:[#allocation2 + $0x18] sm:$0xff] }
 0x11c   : > { %710 = vst.msk [vmem:[#allocation2 + $0x28] sm:$0xff] %vm334_vm0, %v693_v37  ;;  %v1349_v39 = vpop.f32.mrb[12].mxu0  ;;  %v778_v41 = vadd.f32 %v762_v35, %v727_v38  ;;  %v754_v35 = vld [vmem:[%s1821_s22 + $0x60] sm:$0xff]  ;;  %v752_v37 = vld [vmem:[%s1821_s22 + $0x50] sm:$0xff]  ;;  %v753_v38 = vld [vmem:[%s1821_s22 + $0x58] sm:$0xff] }
 0x11d   : > { %v1350_v43 = vpop.f32.mrb[13].mxu0 }
 0x11e   : > { %v1351_v46 = vadd.f32 %v1350_v43, %v1349_v39  ;;  %v1352_v47 = vpop.f32.mrb[14].mxu0  ;;  %v792_v48 = vpack.c.bf16 %v778_v41, %v777_v40  ;;  %v771_v40 = vmul.f32 %v1828_v62, %v754_v35  ;;  %v772_v41 = vmul.f32 %v1828_v62, %v755_v36 }
 0x11f   : > { %v1353_v50 = vpop.f32.mrb[15].mxu0  ;;  %v770_v43 = vmul.f32 %v1828_v62, %v753_v38 }
 0x120   : > { %v694_v51 = vadd.f32 %v1351_v46, %v357_v42  ;;  %v1354_v52 = vadd.f32 %v1353_v50, %v1352_v47  ;;  %1400 = vmatmul.mubr.msk.bf16.vlgmr.msra.gmra.mrb[8].mxu1 %vm334_vm0, %v792_v48  ;;  %v769_v42 = vmul.f32 %v1828_v62, %v752_v37  ;;  %v787_v48 = vadd.f32 %v771_v40, %v736_v44  ;;  %v756_v50 = vld [vmem:[%s1821_s22 + $0x70] sm:$0xff] }
 0x121   : > { %v728_v55 = vld [vmem:[#allocation2 + $0x20] sm:$0xff] }
 0x122   : > { %711 = vst.msk [vmem:[#allocation2 + $0x30] sm:$0xff] %vm334_vm0, %v694_v51  ;;  %v695_v56 = vadd.f32 %v1354_v52, %v358_v49  ;;  %v779_v59 = vadd.f32 %v763_v53, %v728_v55  ;;  %v788_v49 = vadd.f32 %v772_v41, %v737_v45  ;;  %v757_v51 = vld [vmem:[%s1821_s22 + $0x78] sm:$0xff]  ;;  %v773_v55 = vmul.f32 %v1828_v62, %v756_v50 }
 0x123   : > { %v729_v57 = vld [vmem:[#allocation2 + $0x28] sm:$0xff] }
 0x124   : > { %712 = vst.msk [vmem:[#allocation2 + $0x38] sm:$0xff] %vm334_vm0, %v695_v56  ;;  %v1355_v58 = vpop.f32.mrb[16].mxu0  ;;  %v780_v60 = vadd.f32 %v764_v54, %v729_v57  ;;  %v774_v56 = vmul.f32 %v1828_v62, %v757_v51  ;;  %v797_v57 = vpack.c.bf16 %v788_v49, %v787_v48 }
 0x125   : > { %v1356_v63 = vpop.f32.mrb[17].mxu0 }
 0x126   : > { %v1357_v2 = vadd.f32 %v1356_v63, %v1355_v58  ;;  %v1358_v3 = vpop.f32.mrb[18].mxu0  ;;  %v793_v4 = vpack.c.bf16 %v780_v60, %v779_v59  ;;  %v738_v58 = vld [vmem:[#allocation2 + $0x70] sm:$0xff]  ;;  %v739_v59 = vld [vmem:[#allocation2 + $0x78] sm:$0xff] }
 0x127   : > { %v1359_v6 = vpop.f32.mrb[19].mxu0  ;;  %v789_v60 = vadd.f32 %v773_v55, %v738_v58 }
 0x128   : > { %v696_v7 = vadd.f32 %v1357_v2, %v359_v61  ;;  %v1360_v8 = vadd.f32 %v1359_v6, %v1358_v3  ;;  %1403 = vmatprep.mubr.msk.bf16.mxu1 %vm334_vm0, %v793_v4  ;;  %v790_v61 = vadd.f32 %v774_v56, %v739_v59 }
 0x129   : > { %v730_v11 = vld [vmem:[#allocation2 + $0x30] sm:$0xff] }
 0x12a   : > { %713 = vst.msk [vmem:[#allocation2 + $0x40] sm:$0xff] %vm334_vm0, %v696_v7  ;;  %v697_v12 = vadd.f32 %v1360_v8, %v360_v5  ;;  %v781_v15 = vadd.f32 %v765_v9, %v730_v11  ;;  %v798_v63 = vpack.c.bf16 %v790_v61, %v789_v60 }
 0x12b   : > { %v731_v13 = vld [vmem:[#allocation2 + $0x38] sm:$0xff] }
 0x12c   : > { %714 = vst.msk [vmem:[#allocation2 + $0x48] sm:$0xff] %vm334_vm0, %v697_v12  ;;  %v1361_v14 = vpop.f32.mrb[20].mxu0  ;;  %v782_v16 = vadd.f32 %v766_v10, %v731_v13 }
 0x12d   : > { %v1362_v18 = vpop.f32.mrb[21].mxu0 }
 0x12e   : > { %v1363_v21 = vadd.f32 %v1362_v18, %v1361_v14  ;;  %v1364_v22 = vpop.f32.mrb[22].mxu0  ;;  %v794_v23 = vpack.c.bf16 %v782_v16, %v781_v15 }
 0x12f   : > { %v1365_v25 = vpop.f32.mrb[23].mxu0 }
 0x130   : > { %v698_v26 = vadd.f32 %v1363_v21, %v361_v17  ;;  %v1366_v27 = vadd.f32 %v1365_v25, %v1364_v22  ;;  %1404 = vmatmul.mubr.msk.bf16.gmra.mrb[12].mxu1 %vm334_vm0, %v794_v23 }
 0x131   : > { %v732_v30 = vld [vmem:[#allocation2 + $0x40] sm:$0xff] }
 0x132   : > { %715 = vst.msk [vmem:[#allocation2 + $0x50] sm:$0xff] %vm334_vm0, %v698_v26  ;;  %v699_v31 = vadd.f32 %v1366_v27, %v362_v24  ;;  %v783_v33 = vadd.f32 %v767_v28, %v732_v30 }
 0x133   : > { %v733_v32 = vld [vmem:[#allocation2 + $0x48] sm:$0xff] }
 0x134   : > { %716 = vst.msk [vmem:[#allocation2 + $0x58] sm:$0xff] %vm334_vm0, %v699_v31  ;;  %v784_v34 = vadd.f32 %v768_v29, %v733_v32 }
 0x136   : > { %v795_v39 = vpack.c.bf16 %v784_v34, %v783_v33 }
 0x138   : > { %1407 = vmatprep.mubr.msk.bf16.mxu1 %vm334_vm0, %v795_v39 }
 0x139   : > { %v734_v46 = vld [vmem:[#allocation2 + $0x50] sm:$0xff] }
 0x13a   : > { %v785_v52 = vadd.f32 %v769_v42, %v734_v46 }
 0x13b   : > { %v735_v47 = vld [vmem:[#allocation2 + $0x58] sm:$0xff] }
 0x13c   : > { %v786_v53 = vadd.f32 %v770_v43, %v735_v47 }
 0x13e   : > { %v796_v54 = vpack.c.bf16 %v786_v53, %v785_v52 }
 0x140   : > { %1408 = vmatmul.mubr.msk.bf16.gmra.mrb[16].mxu1 %vm334_vm0, %v796_v54 }
 0x141   : > { %1411 = vmatprep.mubr.msk.bf16.mxu1 %vm334_vm0, %v797_v57 }
 0x148   : > { %1412 = vmatmul.mubr.msk.bf16.gmra.mrb[20].mxu1 %vm334_vm0, %v798_v63 }
 0x1f3   : > { %v1401_v1 = vpop.f32.mrb[8].mxu1 }
 0x1f4   : > { %v905_v62 = vadd.f32 %v1401_v1, %v1216_v0  ;;  %v896_v2 = vpop.f32.mrb[9].mxu1 }
 0x1f5   : > { %v897_v3 = vadd.f32 %v1216_v0, %v896_v2  ;;  %v1402_v4 = vpop.f32.mrb[10].mxu1 }
 0x1f6   : > { %v908_v5 = vadd.f32 %v1402_v4, %v1216_v0  ;;  %v899_v6 = vpop.f32.mrb[11].mxu1  ;;  %v961_v8 = vmax.f32 %v905_v62, 0.0 }
 0x1f7   : > { %v900_v7 = vadd.f32 %v1216_v0, %v899_v6  ;;  %v959_v10 = vmax.f32 %v897_v3, 0.0 }
 0x1f8   : > { %v962_v9 = vmax.f32 %v908_v5, 0.0 }
 0x1f9   : > { %v960_v11 = vmax.f32 %v900_v7, 0.0 }
 0x1fa   : > { %v1276_v12 = vpack.c.bf16 %v962_v9, %v961_v8 }
 0x1fb   : > { %v1271_v13 = vpack.c.bf16 %v960_v11, %v959_v10 }
 0x1fc   : > { %1308 = vst [vmem:[%s1887_s29 + $0x8] sm:$0xff] %v1276_v12  }
 0x1fd   : > { %1272 = vst [vmem:[%s1887_s29] sm:$0xff] %v1271_v13  }
 0x203   : > { %v1405_v14 = vpop.f32.mrb[12].mxu1 }
 0x204   : > { %v921_v15 = vadd.f32 %v1405_v14, %v1216_v0  ;;  %v912_v16 = vpop.f32.mrb[13].mxu1 }
 0x205   : > { %v913_v17 = vadd.f32 %v1216_v0, %v912_v16  ;;  %v1406_v18 = vpop.f32.mrb[14].mxu1 }
 0x206   : > { %v924_v19 = vadd.f32 %v1406_v18, %v1216_v0  ;;  %v915_v20 = vpop.f32.mrb[15].mxu1  ;;  %v965_v22 = vmax.f32 %v921_v15, 0.0 }
 0x207   : > { %v916_v21 = vadd.f32 %v1216_v0, %v915_v20  ;;  %v963_v24 = vmax.f32 %v913_v17, 0.0 }
 0x208   : > { %v966_v23 = vmax.f32 %v924_v19, 0.0 }
 0x209   : > { %v964_v25 = vmax.f32 %v916_v21, 0.0 }
 0x20a   : > { %v1286_v26 = vpack.c.bf16 %v966_v23, %v965_v22 }
 0x20b   : > { %v1281_v27 = vpack.c.bf16 %v964_v25, %v963_v24 }
 0x20c   : > { %1310 = vst [vmem:[%s1887_s29 + $0x18] sm:$0xff] %v1286_v26  }
 0x20d   : > { %1309 = vst [vmem:[%s1887_s29 + $0x10] sm:$0xff] %v1281_v27  }
 0x213   : > { %v1409_v28 = vpop.f32.mrb[16].mxu1 }
 0x214   : > { %v937_v29 = vadd.f32 %v1409_v28, %v1216_v0  ;;  %v928_v30 = vpop.f32.mrb[17].mxu1 }
 0x215   : > { %v929_v31 = vadd.f32 %v1216_v0, %v928_v30  ;;  %v1410_v32 = vpop.f32.mrb[18].mxu1 }
 0x216   : > { %v940_v33 = vadd.f32 %v1410_v32, %v1216_v0  ;;  %v931_v34 = vpop.f32.mrb[19].mxu1  ;;  %v969_v36 = vmax.f32 %v937_v29, 0.0 }
 0x217   : > { %v932_v35 = vadd.f32 %v1216_v0, %v931_v34  ;;  %v967_v38 = vmax.f32 %v929_v31, 0.0 }
 0x218   : > { %v970_v37 = vmax.f32 %v940_v33, 0.0 }
 0x219   : > { %v968_v39 = vmax.f32 %v932_v35, 0.0 }
 0x21a   : > { %v1296_v40 = vpack.c.bf16 %v970_v37, %v969_v36 }
 0x21b   : > { %v1291_v41 = vpack.c.bf16 %v968_v39, %v967_v38  ;;  %v1413_v42 = vpop.f32.mrb[20].mxu1 }
 0x21c   : > { %1312 = vst [vmem:[%s1887_s29 + $0x28] sm:$0xff] %v1296_v40   ;;  %v953_v43 = vadd.f32 %v1413_v42, %v1216_v0  ;;  %v944_v44 = vpop.f32.mrb[21].mxu1 }
 0x21d   : > { %1311 = vst [vmem:[%s1887_s29 + $0x20] sm:$0xff] %v1291_v41   ;;  %v945_v45 = vadd.f32 %v1216_v0, %v944_v44  ;;  %v1414_v46 = vpop.f32.mrb[22].mxu1 }
 0x21e   : > { %v956_v47 = vadd.f32 %v1414_v46, %v1216_v0  ;;  %v947_v48 = vpop.f32.mrb[23].mxu1  ;;  %v973_v50 = vmax.f32 %v953_v43, 0.0 }
 0x21f   : > { %v948_v49 = vadd.f32 %v1216_v0, %v947_v48  ;;  %v971_v52 = vmax.f32 %v945_v45, 0.0 }
 0x220   : > { %v974_v51 = vmax.f32 %v956_v47, 0.0 }
 0x221   : > { %v972_v53 = vmax.f32 %v948_v49, 0.0 }
 0x222   : > { %v1306_v54 = vpack.c.bf16 %v974_v51, %v973_v50 }
 0x223   : > { %v1301_v55 = vpack.c.bf16 %v972_v53, %v971_v52 }
 0x224   : > { %1314 = vst [vmem:[%s1887_s29 + $0x38] sm:$0xff] %v1306_v54  }
 0x225   : > { %1313 = vst [vmem:[%s1887_s29 + $0x30] sm:$0xff] %v1301_v55  }
 0x226   : > { %1546 = shalt.err (!%p1543_p5)
}
 0x227   : > { %s1547_s22 = scalar_lea.hbm %s1900_s16, 1024  ;;  %s1551_s20 = scalar_lea.hbm %s1960_s6, 2048 }
 0x228   : > { %p1548_p6 = scmp.ne.s32.totalorder %s1900_s16, %s1547_s22  ;;  %p1552_p10 = scmp.lt.u32.totalorder %s1900_s16, %s1960_s6 }
 0x229   : > { %p1553_p11 = scmp.lt.u32.totalorder %s1551_s20, %s1547_s22  ;;  %p1555_p13 = scmp.lt.u32.totalorder %s1547_s22, %s1900_s16 }
 0x22a   : > { %p1549_p7 = pnand %p1548_p6, %p1695_p4 }
 0x22b   : > { %p1554_p12 = por %p1553_p11, %p1552_p10 }
 0x22c   : > { %p1550_p9 = pneg %p1549_p7 }
 0x22d   : > { %p1556_p0 = por %p1555_p13, %p1554_p12 }
 0x22f   : > { %p1557_p1 = pnand %p1556_p0, %p1550_p9 }
 0x231   : > { %1560 = shalt.err (!%p1557_p1)
}
 0x232   : > { %s1615_s7 = smov 64   ;;  %s1616_s12 = smov 4  }
 0x233   : > { %1431 = dma.vmem_to_hbm [thread:$0]  (%p1695_p4), %s1902_s9, 1024, %s1900_s16, %s1908_s26, %s1615_s7, %s1615_s7, %s1616_s12  }
 0x234 PF: > { %p1437_p2 = scmp.ge.s32.totalorder %s1611_s28, 2  ;;  %s1084_s13 = sand.u32 1, %s1591_s23  }
 0x235   : > { %s1085_s17 = scalar_lea.sflag [#allocation5], %s1084_s13 }
 0x236   : > { %p1434_p3 = pnand %p1437_p2, %p1702_p8 }
 0x238   : > { %1586 = dma.done.wait (!%p1434_p3), %s1085_s17, 1024  }
 0x239   : > { %1588 = vsyncadd (!%p1434_p3), %s1085_s17, 4294966272  ;;  %s20_s28 = sadd.s32 1, %s1611_s28   ;;  %s1963_s23 = smov %s1595_s24 }
 0x23a   : > { %p17_p5 = scmp.ge.s32.totalorder %s20_s28, 4   ;;  %s1964_s24 = smov %s1599_s25 }
 0x23b   : > { %s1965_s25 = smov %s1708_s11  ;;  %s1966_s26 = smov %s1607_s27 }
 0x23c   : > { %s1967_s27 = smov %s1969_s30  ;;  %19 = sbr.rel (!%p17_p5) target bundleno = 6 (0x6), region = 93 }
 0x243   :  { %1090 = vsyncpa [#allocation5], 1 }
 0x244   :  { %1092 = vsyncpa [#allocation5 + $0x1], 1 }

</bundles_post_ra>
